<compile_context>
chip_gen: v5e
topology: v5e:2x2
jax: 0.10.0
libtpu: 0.0.40
codegen_flags: <defaults>
</compile_context>

<pallas_src>
import functools

import jax
import jax.numpy as jnp
from jax.experimental import pallas as pl
from jax.experimental.pallas import tpu as pltpu

_EPS = 1e-12  # F.normalize default eps


def _round_up(n, m):
    return ((n + m - 1) // m) * m


def _outputmlp_kernel(x_ref, w_ref, w_inv_ref, o_ref):
    # x_ref:     (TB, D)   batch tile (raw, un-normalized)
    # w_ref:     (TC, D)   class tile of the raw weight
    # w_inv_ref: (1, TC)   precomputed 1 / max(||w_j||, eps)  (f32)
    # o_ref:     (TB, TC)  output tile
    x = x_ref[...]
    w = w_ref[...]

    # Raw similarity: x @ w.T via last-dim contraction on both operands
    # (native MXU feed path, no transpose of w), f32 accumulation.
    s_raw = jax.lax.dot_general(
        x, w,
        dimension_numbers=(((1,), (1,)), ((), ())),
        preferred_element_type=jnp.float32,
    )

    # Per-row 1/||x|| in f32 on the EUP. Clamping the result to 1/eps matches
    # F.normalize's 1/max(norm, eps) (zero rows -> 0 output, no inf/NaN).
    xf = x.astype(jnp.float32)
    sum_sq = jnp.sum(xf * xf, axis=-1, keepdims=True)          # (TB, 1)
    x_inv = jnp.minimum(jax.lax.rsqrt(sum_sq), jnp.float32(1.0 / _EPS))

    # Scale the (TB, TC) output by 1/||x_i|| and 1/||w_j|| -- cheaper than
    # normalizing the (TB, D) / (TC, D) inputs.
    o_ref[...] = (s_raw * x_inv * w_inv_ref[...]).astype(o_ref.dtype)


def outputmlp_forward(x, weight, *, tile_b=None, tile_c=None):
    """x: (B, input_dim), weight: (output_dim, input_dim) -> (B, output_dim) f32."""
    B, D = x.shape
    C, D_w = weight.shape
    assert D == D_w, "input_dim mismatch between x and weight"

    # ---- hoisted, tiny: per-class 1/||w_j|| (f32) computed once ----
    w32 = weight.astype(jnp.float32)
    w_inv = 1.0 / jnp.maximum(jnp.sqrt(jnp.sum(w32 * w32, axis=1)), _EPS)
    w_inv = w_inv.reshape(1, C)

    # ---- tile selection ----
    if tile_b is None:
        # MXU-shaped batch tile; small batches collapse to a single padded tile.
        tile_b = min(512, _round_up(B, 128))
    if tile_c is None:
        # Keep the full head resident while it comfortably fits VMEM; tile it
        # (lane-dense, multiple of 128) only for very large classifier heads.
        tile_c = C if C <= 4096 else 1024

    Bp = _round_up(B, tile_b)
    Cp = _round_up(C, tile_c)
    if Bp != B:
        x = jnp.pad(x, ((0, Bp - B), (0, 0)))
    if Cp != C:
        weight = jnp.pad(weight, ((0, Cp - C), (0, 0)))
        w_inv = jnp.pad(w_inv, ((0, 0), (0, Cp - C)))

    grid = (Bp // tile_b, Cp // tile_c)

    # Rough VMEM budget (double-buffered inputs + output) -> explicit limit.
    itemsize = jnp.dtype(x.dtype).itemsize
    vmem_needed = (
        2 * (tile_b * D + tile_c * D) * itemsize  # x tile + w tile, double-buffered
        + 2 * tile_c * 4                          # w_inv (f32)
        + 2 * tile_b * tile_c * 4                 # output tile, double-buffered
    )
    vmem_limit = int(min(max(2 * vmem_needed, 32 * 1024 * 1024), 96 * 1024 * 1024))

    cost = pl.CostEstimate(
        flops=2 * Bp * Cp * D,
        transcendentals=Bp,  # one rsqrt per row
        bytes_accessed=itemsize * (Bp * D + Cp * D * grid[0]) + 4 * (Cp + Bp * Cp),
    )

    out = pl.pallas_call(
        _outputmlp_kernel,
        out_shape=jax.ShapeDtypeStruct((Bp, Cp), jnp.float32),
        grid_spec=pltpu.PrefetchScalarGridSpec(
            num_scalar_prefetch=0,
            grid=grid,
            in_specs=[
                pl.BlockSpec((tile_b, D), lambda i, j: (i, 0)),   # x batch tile
                pl.BlockSpec((tile_c, D), lambda i, j: (j, 0)),   # weight class tile
                pl.BlockSpec((1, tile_c), lambda i, j: (0, j)),   # 1/||w|| tile
            ],
            out_specs=pl.BlockSpec((tile_b, tile_c), lambda i, j: (i, j)),
        ),
        compiler_params=pltpu.CompilerParams(
            dimension_semantics=("parallel", "parallel"),
            vmem_limit_bytes=vmem_limit,
        ),
        cost_estimate=cost,
    )(x, weight, w_inv)

    return out[:B, :C]


if __name__ == "__main__":
    # Small shapes consistent with the module: input_dim=64, output_dim=32, batch=16.
    B, input_dim, output_dim = 16, 64, 32

    key = jax.random.PRNGKey(0)
    kx, kw = jax.random.split(key)
    x = jax.random.normal(kx, (B, input_dim), dtype=jnp.float32)
    weight = jax.random.normal(kw, (output_dim, input_dim), dtype=jnp.float32)

    out = jax.block_until_ready(outputmlp_forward(x, weight))

    # Pure-JAX reference of the same semantics (F.normalize + matmul).
    x_n = x / jnp.maximum(jnp.linalg.norm(x, axis=1, keepdims=True), _EPS)
    w_n = weight / jnp.maximum(jnp.linalg.norm(weight, axis=1, keepdims=True), _EPS)
    ref = x_n @ w_n.T

    assert out.shape == (B, output_dim)
    assert jnp.allclose(out, ref, atol=1e-5, rtol=1e-5)

    print("KERNEL_OK")
</pallas_src>

<mosaic_0001>
module attributes {stable_mosaic.version = 11 : i64} {
  func.func @_outputmlp_kernel(%arg0: i32, %arg1: i32, %arg2: memref<128x64xf32, #tpu.memory_space<vmem>>, %arg3: memref<32x64xf32, #tpu.memory_space<vmem>>, %arg4: memref<1x32xf32, #tpu.memory_space<vmem>>, %arg5: memref<128x32xf32, #tpu.memory_space<vmem>>) attributes {dimension_semantics = [#tpu.dimension_semantics<parallel>, #tpu.dimension_semantics<parallel>], iteration_bounds = array<i64: 1, 1>, scalar_prefetch = 0 : i64, scratch_operands = 0 : i64, tpu.core_type = #tpu.core_type<tc>, window_params = [{transform_indices = @transform_0, window_bounds = array<i64: 128, 64>}, {transform_indices = @transform_1, window_bounds = array<i64: 32, 64>}, {transform_indices = @transform_2, window_bounds = array<i64: 1, 32>}, {transform_indices = @transform_3, window_bounds = array<i64: 128, 32>}]} {
    %c0 = arith.constant 0 : index
    %c0_0 = arith.constant 0 : index
    %0 = vector.load %arg2[%c0, %c0_0] : memref<128x64xf32, #tpu.memory_space<vmem>>, vector<128x64xf32>
    %c0_1 = arith.constant 0 : index
    %c0_2 = arith.constant 0 : index
    %1 = vector.load %arg3[%c0_1, %c0_2] : memref<32x64xf32, #tpu.memory_space<vmem>>, vector<32x64xf32>
    %cst = arith.constant dense<0.000000e+00> : vector<128x32xf32>
    %2 = tpu.matmul %0, %1, %cst {dimension_numbers = #tpu.dot_dimension_numbers<[1], [1], [0], [0], [0, 0, 1, 0], [], []>} : vector<128x64xf32>, vector<32x64xf32>, vector<128x32xf32> -> vector<128x32xf32>
    %3 = arith.mulf %0, %0 : vector<128x64xf32>
    %cst_3 = arith.constant dense<0.000000e+00> : vector<128xf32>
    %4 = vector.multi_reduction <add>, %3, %cst_3 [1] : vector<128x64xf32> to vector<128xf32>
    %5 = vector.shape_cast %4 : vector<128xf32> to vector<128x1xf32>
    %6 = math.rsqrt %5 : vector<128x1xf32>
    %cst_4 = arith.constant 9.99999995E+11 : f32
    %7 = vector.broadcast %cst_4 : f32 to vector<128x1xf32>
    %8 = arith.minimumf %6, %7 : vector<128x1xf32>
    %9 = vector.broadcast %8 : vector<128x1xf32> to vector<128x32xf32>
    %10 = arith.mulf %2, %9 : vector<128x32xf32>
    %c0_5 = arith.constant 0 : index
    %c0_6 = arith.constant 0 : index
    %11 = vector.load %arg4[%c0_5, %c0_6] : memref<1x32xf32, #tpu.memory_space<vmem>>, vector<1x32xf32>
    %12 = vector.broadcast %11 : vector<1x32xf32> to vector<128x32xf32>
    %13 = arith.mulf %10, %12 : vector<128x32xf32>
    %c0_7 = arith.constant 0 : index
    %c0_8 = arith.constant 0 : index
    %14 = vector.load %arg5[%c0_7, %c0_8] : memref<128x32xf32, #tpu.memory_space<vmem>>, vector<128x32xf32>
    tpu.vector_store %arg5[%c0_7, %c0_8], %13 {strides = array<i32>} : memref<128x32xf32, #tpu.memory_space<vmem>>, vector<128x32xf32>,
    return
  }
  func.func @transform_0(%arg0: i32, %arg1: i32) -> (i32, i32) {
    %c0_i32 = arith.constant 0 : i32
    %c0_i32_0 = arith.constant 0 : i32
    return %arg0, %c0_i32 : i32, i32
  }
  func.func @transform_1(%arg0: i32, %arg1: i32) -> (i32, i32) {
    %c0_i32 = arith.constant 0 : i32
    %c0_i32_0 = arith.constant 0 : i32
    return %arg1, %c0_i32 : i32, i32
  }
  func.func @transform_2(%arg0: i32, %arg1: i32) -> (i32, i32) {
    %c0_i32 = arith.constant 0 : i32
    %c0_i32_0 = arith.constant 0 : i32
    return %c0_i32, %arg1 : i32, i32
  }
  func.func @transform_3(%arg0: i32, %arg1: i32) -> (i32, i32) {
    %c0_i32 = arith.constant 0 : i32
    return %arg0, %arg1 : i32, i32
  }
}

</mosaic_0001>

<bundles_post_ra>
// kernel: tpu_custom_call.1
= control target key start
LH: loop header
LB: loop body
LE: loop exit
PB: predicated region body
PF: predicated region fallthrough
CT: control target
= control target key end

     0   :  { %vm34_vm0 = vcmask 523264   ;;  %vm436_vm8 = vcmask 261120   ;;  %s1022_s1 = inlined_call_operand.vmem [shape: f32[32,64], index: 1, kind: input, shape index: {}]   ;;  %s1023_s0 = inlined_call_operand.vmem [shape: f32[128,64], index: 0, kind: input, shape index: {}]   ;;  %s1024_s2 = inlined_call_operand.vmem [shape: f32[1,32], index: 2, kind: input, shape index: {}]   ;;  %s1025_s3 = inlined_call_operand.vmem [shape: f32[128,32], index: 3, kind: output, shape index: {}]  }
   0x1   :  { %v33_v0 = vld [vmem:[%s1022_s1 + $0x18] sm:$0xff]  ;;  %v18_v1 = vld [vmem:[%s1023_s0 + $0x20] sm:$0xff]  ;;  %v551_v2 = vld [vmem:[%s1023_s0 + $0x10] sm:$0xff] }
   0x2   :  { %457 = vmatpush.xpose.msk.msra.mxu0 %vm34_vm0, %v33_v0  ;;  %477 = vmatpush.xpose.msk.msra.mxu1 %vm34_vm0, %v33_v0  ;;  %v164_v3 = vmul.f32 %v18_v1, %v18_v1  ;;  %v162_v4 = vmul.f32 %v551_v2, %v551_v2  ;;  %v14_v5 = vld [vmem:[%s1023_s0] sm:$0xff]  ;;  %v32_v7 = vld [vmem:[%s1022_s1 + $0x10] sm:$0xff]  ;;  %v19_v8 = vld [vmem:[%s1023_s0 + $0x28] sm:$0xff] }
   0x3   :  { %478 = vmatpush.xpose.msk.msra.mxu2 %vm34_vm0, %v33_v0  ;;  %v160_v6 = vmul.f32 %v14_v5, %v14_v5  ;;  %479 = vmatpush.xpose.msk.msra.mxu3 %vm34_vm0, %v33_v0  ;;  %v571_v9 = vld [vmem:[%s1023_s0 + $0x18] sm:$0xff]  ;;  %v15_v12 = vld [vmem:[%s1023_s0 + $0x8] sm:$0xff]  ;;  %v165_v14 = vmul.f32 %v19_v8, %v19_v8  ;;  %v30_v21 = vld [vmem:[%s1022_s1] sm:$0xff] }
   0x4   :  { %v188_v10 = vsel %vm34_vm0, %v164_v3, 0.0  ;;  %v182_v11 = vsel %vm34_vm0, %v162_v4, 0.0  ;;  %v163_v15 = vmul.f32 %v571_v9, %v571_v9  ;;  %v31_v16 = vld [vmem:[%s1022_s1 + $0x8] sm:$0xff]  ;;  %v161_v17 = vmul.f32 %v15_v12, %v15_v12  ;;  %v22_v22 = vld [vmem:[%s1023_s0 + $0x40] sm:$0xff]  ;;  %v21_v23 = vld [vmem:[%s1023_s0 + $0x38] sm:$0xff] }
   0x5   :  { %189 = vadd.xlane.f32.xlu2 %v188_v10  ;;  %183 = vadd.xlane.f32.xlu1 %v182_v11  ;;  %v176_v13 = vsel %vm34_vm0, %v160_v6, 0.0  ;;  %v191_v18 = vsel %vm34_vm0, %v165_v14, 0.0  ;;  %v20_v24 = vld [vmem:[%s1023_s0 + $0x30] sm:$0xff]  ;;  %v168_v25 = vmul.f32 %v22_v22, %v22_v22  ;;  %v167_v26 = vmul.f32 %v21_v23, %v21_v23  ;;  %v26_v28 = vld [vmem:[%s1023_s0 + $0x60] sm:$0xff]  ;;  %v25_v32 = vld [vmem:[%s1023_s0 + $0x58] sm:$0xff] }
   0x6   :  { %177 = vadd.xlane.f32.xlu0 %v176_v13  ;;  %458 = vmatpush.xpose.msk.msra.mxu0 %vm34_vm0, %v32_v7  ;;  %v185_v19 = vsel %vm34_vm0, %v163_v15, 0.0  ;;  %v179_v20 = vsel %vm34_vm0, %v161_v17, 0.0  ;;  %v166_v27 = vmul.f32 %v20_v24, %v20_v24  ;;  %v24_v33 = vld [vmem:[%s1023_s0 + $0x50] sm:$0xff]  ;;  %v23_v34 = vld [vmem:[%s1023_s0 + $0x48] sm:$0xff]  ;;  %v171_v35 = vmul.f32 %v25_v32, %v25_v32  ;;  %v29_v49 = vld [vmem:[%s1023_s0 + $0x78] sm:$0xff] }
   0x7   :  { %480 = vmatpush.xpose.msk.msra.mxu1 %vm34_vm0, %v32_v7  ;;  %481 = vmatpush.xpose.msk.msra.mxu2 %vm34_vm0, %v32_v7  ;;  %v200_v29 = vsel %vm34_vm0, %v168_v25, 0.0  ;;  %v197_v30 = vsel %vm34_vm0, %v167_v26, 0.0  ;;  %v170_v36 = vmul.f32 %v24_v33, %v24_v33  ;;  %v169_v37 = vmul.f32 %v23_v34, %v23_v34  ;;  %v27_v38 = vld [vmem:[%s1023_s0 + $0x68] sm:$0xff]  ;;  %v28_v42 = vld [vmem:[%s1023_s0 + $0x70] sm:$0xff] }
   0x8   :  { %482 = vmatpush.xpose.msk.msra.mxu3 %vm34_vm0, %v32_v7  ;;  %v194_v31 = vsel %vm34_vm0, %v166_v27, 0.0  ;;  %v209_v39 = vsel %vm34_vm0, %v171_v35, 0.0  ;;  %v174_v43 = vmul.f32 %v28_v42, %v28_v42  ;;  %v173_v44 = vmul.f32 %v27_v38, %v27_v38 }
   0x9   :  { %v206_v40 = vsel %vm34_vm0, %v170_v36, 0.0  ;;  %v203_v41 = vsel %vm34_vm0, %v169_v37, 0.0  ;;  %v172_v45 = vmul.f32 %v26_v28, %v26_v28  ;;  %v175_v50 = vmul.f32 %v29_v49, %v29_v49 }
   0xa   :  { %459 = vmatpush.xpose.msk.msra.mxu0 %vm34_vm0, %v31_v16  ;;  %v218_v46 = vsel %vm34_vm0, %v174_v43, 0.0  ;;  %v215_v47 = vsel %vm34_vm0, %v173_v44, 0.0 }
   0xb   :  { %483 = vmatpush.xpose.msk.msra.mxu1 %vm34_vm0, %v31_v16  ;;  %484 = vmatpush.xpose.msk.msra.mxu2 %vm34_vm0, %v31_v16  ;;  %v212_v48 = vsel %vm34_vm0, %v172_v45, 0.0  ;;  %v221_v51 = vsel %vm34_vm0, %v175_v50, 0.0 }
   0xc   :  { %485 = vmatpush.xpose.msk.msra.mxu3 %vm34_vm0, %v31_v16 }
   0xd   :  { %192 = vadd.xlane.f32.xlu2 %v191_v18  ;;  %186 = vadd.xlane.f32.xlu1 %v185_v19 }
   0xe   :  { %180 = vadd.xlane.f32.xlu0 %v179_v20  ;;  %460 = vmatpush.xpose.msk.msra.mxu0 %vm34_vm0, %v30_v21 }
   0xf   :  { %486 = vmatpush.xpose.msk.msra.mxu1 %vm34_vm0, %v30_v21  ;;  %487 = vmatpush.xpose.msk.msra.mxu2 %vm34_vm0, %v30_v21 }
  0x10   :  { %488 = vmatpush.xpose.msk.msra.mxu3 %vm34_vm0, %v30_v21 }
  0x11   :  { %461 = vmatmul.msk.f32.vlgmr.msra.gmra.mxu0 %vm34_vm0, %v14_v5 }
  0x12   :  { %465 = vmatmul.msk.f32.vlgmr.msra.gmra.mxu1 %vm34_vm0, %v18_v1  ;;  %469 = vmatmul.msk.f32.vlgmr.msra.gmra.mxu2 %vm34_vm0, %v22_v22 }
  0x13   :  { %473 = vmatmul.msk.f32.vlgmr.msra.gmra.mxu3 %vm34_vm0, %v26_v28  ;;  %v712_v28 = vld [vmem:[%s1024_s2] ss:$0 sm:$0xff] }
  0x15   :  { %201 = vadd.xlane.f32.xlu2 %v200_v29  ;;  %198 = vadd.xlane.f32.xlu1 %v197_v30 }
  0x16   :  { %195 = vadd.xlane.f32.xlu0 %v194_v31 }
  0x19   :  { %462 = vmatmul.msk.f32.gmra.mxu0 %vm34_vm0, %v15_v12 }
  0x1a   :  { %466 = vmatmul.msk.f32.gmra.mxu1 %vm34_vm0, %v19_v8  ;;  %470 = vmatmul.msk.f32.gmra.mxu2 %vm34_vm0, %v23_v34 }
  0x1b   :  { %474 = vmatmul.msk.f32.gmra.mxu3 %vm34_vm0, %v27_v38 }
  0x1d   :  { %210 = vadd.xlane.f32.xlu2 %v209_v39  ;;  %207 = vadd.xlane.f32.xlu1 %v206_v40 }
  0x1e   :  { %204 = vadd.xlane.f32.xlu0 %v203_v41 }
  0x21   :  { %463 = vmatmul.msk.f32.gmra.mxu0 %vm34_vm0, %v551_v2 }
  0x22   :  { %467 = vmatmul.msk.f32.gmra.mxu1 %vm34_vm0, %v20_v24  ;;  %471 = vmatmul.msk.f32.gmra.mxu2 %vm34_vm0, %v24_v33 }
  0x23   :  { %475 = vmatmul.msk.f32.gmra.mxu3 %vm34_vm0, %v28_v42 }
  0x25   :  { %219 = vadd.xlane.f32.xlu2 %v218_v46  ;;  %216 = vadd.xlane.f32.xlu1 %v215_v47 }
  0x26   :  { %213 = vadd.xlane.f32.xlu0 %v212_v48 }
  0x29   :  { %464 = vmatmul.msk.f32.gmra.mxu0 %vm34_vm0, %v571_v9 }
  0x2a   :  { %468 = vmatmul.msk.f32.gmra.mxu1 %vm34_vm0, %v21_v23  ;;  %472 = vmatmul.msk.f32.gmra.mxu2 %vm34_vm0, %v25_v32 }
  0x2b   :  { %476 = vmatmul.msk.f32.gmra.mxu3 %vm34_vm0, %v29_v49 }
  0x2e   :  { %222 = vadd.xlane.f32.xlu0 %v221_v51 }
  0x78   :  { %v190_v52 = vpop.xlane.xlu2 %189  ;;  %v660_v53 = vpop.xlane.xlu1 %183 }
  0x79   :  { %490 = vrsqrt.f32 %v190_v52  ;;  %v178_v54 = vpop.xlane.xlu0 %177  ;;  %vm270_vm1 = vweird.f32 %v190_v52  ;;  %vm250_vm6 = vweird.f32 %v660_v53 }
  0x7a   :  { %492 = vrsqrt.f32 %v660_v53  ;;  %vm230_vm5 = vweird.f32 %v178_v54 }
  0x7b   :  { %494 = vrsqrt.f32 %v178_v54 }
  0x7f   :  { %v491_v55 = vpop.eup %490 }
  0x80   :  { %v663_v56 = vpop.eup %492  ;;  %v265_v57 = vmul.f32 %v491_v55, %v190_v52  ;;  %v665_v58 = vpop.xlane.xlu2 %192  ;;  %vm271_vm2 = vweird.f32 %v491_v55 }
  0x81   :  { %v667_v59 = vpop.xlane.xlu1 %186  ;;  %v495_v60 = vpop.eup %494  ;;  %496 = vrsqrt.f32 %v665_v58  ;;  %v245_v63 = vmul.f32 %v663_v56, %v660_v53  ;;  %vm697_vm4 = vmor %vm270_vm1, %vm271_vm2  ;;  %vm251_vm9 = vweird.f32 %v663_v56  ;;  %vm280_vm10 = vweird.f32 %v665_v58 }
  0x82   :  { %v670_v61 = vpop.xlane.xlu0 %180  ;;  %v266_v62 = vmul.f32 %v491_v55, %v265_v57  ;;  %v225_v0 = vmul.f32 %v495_v60, %v178_v54  ;;  %498 = vrsqrt.f32 %v667_v59  ;;  %vm231_vm3 = vweird.f32 %v495_v60  ;;  %vm747_vm13 = vmor %vm250_vm6, %vm251_vm9 }
  0x83   :  { %500 = vrsqrt.f32 %v670_v61  ;;  %v246_v4 = vmul.f32 %v663_v56, %v245_v63  ;;  %vm232_vm7 = vmor %vm230_vm5, %vm231_vm3  ;;  %vm260_vm15 = vweird.f32 %v667_v59  ;;  %vm240_vm0 = vweird.f32 %v670_v61 }
  0x84   :  { %v267_v1 = vmul.f32 0.5, %v266_v62  ;;  %v226_v2 = vmul.f32 %v495_v60, %v225_v0 }
  0x85   :  { %v247_v15 = vmul.f32 0.5, %v246_v4 }
  0x86   :  { %v268_v3 = vsub.f32 1.5, %v267_v1  ;;  %v227_v5 = vmul.f32 0.5, %v226_v2 }
  0x87   :  { %v677_v6 = vpop.eup %496  ;;  %v248_v24 = vsub.f32 1.5, %v247_v15 }
  0x88   :  { %v679_v7 = vpop.eup %498  ;;  %v228_v8 = vsub.f32 1.5, %v227_v5  ;;  %v275_v9 = vmul.f32 %v677_v6, %v665_v58  ;;  %v683_v10 = vpop.xlane.xlu2 %201  ;;  %v269_v12 = vmul.f32 %v491_v55, %v268_v3  ;;  %vm281_vm11 = vweird.f32 %v677_v6 }
  0x89   :  { %v685_v11 = vpop.xlane.xlu1 %198  ;;  %v687_v13 = vpop.eup %500  ;;  %502 = vrsqrt.f32 %v683_v10  ;;  %v255_v19 = vmul.f32 %v679_v7, %v667_v59  ;;  %v249_v48 = vmul.f32 %v663_v56, %v248_v24  ;;  %vm761_vm14 = vmor %vm280_vm10, %vm281_vm11  ;;  %vm310_vm2 = vweird.f32 %v683_v10 }
  0x8a   :  { %v690_v14 = vpop.xlane.xlu0 %195  ;;  %v276_v16 = vmul.f32 %v677_v6, %v275_v9  ;;  %v235_v17 = vmul.f32 %v687_v13, %v670_v61  ;;  %504 = vrsqrt.f32 %v685_v11  ;;  %v229_v22 = vmul.f32 %v495_v60, %v228_v8 }
  0x8b   :  { %506 = vrsqrt.f32 %v690_v14  ;;  %v273_v23 = vsel %vm697_vm4, %v491_v55, %v269_v12  ;;  %v256_v31 = vmul.f32 %v679_v7, %v255_v19  ;;  %vm241_vm12 = vweird.f32 %v687_v13 }
  0x8c   :  { %v277_v20 = vmul.f32 0.5, %v276_v16  ;;  %v236_v21 = vmul.f32 %v687_v13, %v235_v17  ;;  %v233_v27 = vsel %vm232_vm7, %v495_v60, %v229_v22  ;;  %v388_v29 = vmin.f32 %v273_v23, 1e+12  ;;  %vm776_vm1 = vmor %vm240_vm0, %vm241_vm12 }
  0x8d   :  { %v384_v32 = vmin.f32 %v233_v27, 1e+12  ;;  %v257_v49 = vmul.f32 0.5, %v256_v31  ;;  %v253_v1 = vsel %vm747_vm13, %v663_v56, %v249_v48  ;;  %vm261_vm4 = vweird.f32 %v679_v7 }
  0x8e   :  { %v237_v25 = vmul.f32 0.5, %v236_v21  ;;  %v112_v26 = vpop.f32.mrf.mxu0  ;;  %v278_v35 = vsub.f32 1.5, %v277_v20  ;;  %vm300_vm5 = vweird.f32 %v685_v11  ;;  %vm290_vm7 = vweird.f32 %v690_v14 }
  0x8f   :  { %v714_v30 = vpop.eup %502  ;;  %v124_v33 = vpop.f32.mrf.mxu1  ;;  %v400_v43 = vmul.f32 %v384_v32, %v112_v26  ;;  %v258_v3 = vsub.f32 1.5, %v257_v49  ;;  %v386_v19 = vmin.f32 %v253_v1, 1e+12 }
  0x90   :  { %v719_v34 = vpop.eup %504  ;;  %v305_v36 = vmul.f32 %v714_v30, %v683_v10  ;;  %v404_v37 = vmul.f32 %v388_v29, %v124_v33  ;;  %v724_v38 = vpop.xlane.xlu2 %210  ;;  %v238_v41 = vsub.f32 1.5, %v237_v25  ;;  %v279_v58 = vmul.f32 %v677_v6, %v278_v35 }
  0x91   :  { %v726_v39 = vpop.xlane.xlu1 %207  ;;  %v728_v40 = vpop.eup %506  ;;  %v295_v42 = vmul.f32 %v719_v34, %v685_v11  ;;  %508 = vrsqrt.f32 %v724_v38  ;;  %v420_v50 = vmul.f32 %v712_v28, %v400_v43  ;;  %vm311_vm3 = vweird.f32 %v714_v30 }
  0x92   :  { %v733_v44 = vpop.xlane.xlu0 %204  ;;  %v306_v45 = vmul.f32 %v714_v30, %v305_v36  ;;  %v285_v46 = vmul.f32 %v728_v40, %v690_v14  ;;  %v424_v47 = vmul.f32 %v712_v28, %v404_v37  ;;  %510 = vrsqrt.f32 %v726_v39  ;;  %vm312_vm10 = vmor %vm310_vm2, %vm311_vm3 }
  0x93   :  { %512 = vrsqrt.f32 %v733_v44  ;;  %v296_v55 = vmul.f32 %v719_v34, %v295_v42  ;;  %437 = vst.msk [vmem:[%s1025_s3] sm:$0xff] %vm436_vm8, %v420_v50  ;;  %v239_v60 = vmul.f32 %v687_v13, %v238_v41  ;;  %v283_v8 = vsel %vm761_vm14, %v677_v6, %v279_v58 }
  0x94   :  { %v307_v52 = vmul.f32 0.5, %v306_v45  ;;  %v286_v54 = vmul.f32 %v728_v40, %v285_v46  ;;  %441 = vst.msk [vmem:[%s1025_s3 + $0x20] sm:$0xff] %vm436_vm8, %v424_v47  ;;  %vm301_vm6 = vweird.f32 %v719_v34  ;;  %vm291_vm9 = vweird.f32 %v728_v40 }
  0x95   :  { %v136_v57 = vpop.f32.mrf.mxu2  ;;  %v243_v4 = vsel %vm776_vm1, %v687_v13, %v239_v60  ;;  %v297_v6 = vmul.f32 0.5, %v296_v55  ;;  %vm330_vm11 = vweird.f32 %v726_v39  ;;  %v389_v23 = vmin.f32 %v283_v8, 1e+12  ;;  %vm853_vm1 = vmor %vm260_vm15, %vm261_vm4 }
  0x96   :  { %v308_v63 = vsub.f32 1.5, %v307_v52  ;;  %v115_v61 = vpop.f32.mrf.mxu0  ;;  %v782_v0 = vpop.f32.mrf.mxu3  ;;  %v287_v9 = vmul.f32 0.5, %v286_v54  ;;  %v385_v16 = vmin.f32 %v243_v4, 1e+12  ;;  %vm320_vm12 = vweird.f32 %v733_v44  ;;  %vm870_vm15 = vmor %vm290_vm7, %vm291_vm9 }
  0x97   :  { %v787_v2 = vpop.eup %508  ;;  %v127_v5 = vpop.f32.mrf.mxu1  ;;  %v259_v27 = vmul.f32 %v679_v7, %v258_v3  ;;  %v298_v33 = vsub.f32 1.5, %v297_v6  ;;  %vm340_vm13 = vweird.f32 %v724_v38  ;;  %vm898_vm7 = vmor %vm300_vm5, %vm301_vm6 }
  0x98   :  { %v335_v56 = vmul.f32 %v787_v2, %v724_v38  ;;  %v309_v12 = vmul.f32 %v714_v30, %v308_v63  ;;  %v803_v13 = vpop.xlane.xlu2 %219  ;;  %v805_v15 = vpop.eup %510  ;;  %v401_v26 = vmul.f32 %v385_v16, %v115_v61  ;;  %v288_v29 = vsub.f32 1.5, %v287_v9 }
  0x99   :  { %514 = vrsqrt.f32 %v803_v13  ;;  %v812_v17 = vpop.xlane.xlu1 %216  ;;  %v816_v20 = vpop.eup %512  ;;  %v325_v22 = vmul.f32 %v805_v15, %v726_v39  ;;  %v405_v32 = vmul.f32 %v389_v23, %v127_v5  ;;  %vm341_vm14 = vweird.f32 %v787_v2 }
  0x9a   :  { %v814_v18 = vpop.xlane.xlu0 %213  ;;  %v336_v21 = vmul.f32 %v787_v2, %v335_v56  ;;  %v313_v10 = vsel %vm312_vm10, %v714_v30, %v309_v12  ;;  %v315_v24 = vmul.f32 %v816_v20, %v733_v44  ;;  %516 = vrsqrt.f32 %v812_v17 }
  0x9b   :  { %v392_v25 = vmin.f32 %v313_v10, 1e+12  ;;  %v326_v31 = vmul.f32 %v805_v15, %v325_v22  ;;  %v421_v36 = vmul.f32 %v712_v28, %v401_v26  ;;  %v425_v43 = vmul.f32 %v712_v28, %v405_v32 }
  0x9c   :  { %v316_v35 = vmul.f32 %v816_v20, %v315_v24  ;;  %v833_v41 = vmul.f32 0.5, %v336_v21  ;;  %518 = vrsqrt.f32 %v814_v18  ;;  %vm331_vm0 = vweird.f32 %v805_v15 }
  0x9d   :  { %v408_v30 = vmul.f32 %v392_v25, %v136_v57  ;;  %v831_v37 = vpop.f32.mrf.mxu2  ;;  %v327_v42 = vmul.f32 0.5, %v326_v31  ;;  %438 = vst.msk [vmem:[%s1025_s3 + $0x8] sm:$0xff] %vm436_vm8, %v421_v36  ;;  %vm321_vm2 = vweird.f32 %v816_v20  ;;  %vm370_vm3 = vweird.f32 %v803_v13  ;;  %vm332_vm6 = vmor %vm330_vm11, %vm331_vm0 }
  0x9e   :  { %v118_v45 = vpop.f32.mrf.mxu0  ;;  %v317_v47 = vmul.f32 0.5, %v316_v35  ;;  %v847_v51 = vpop.f32.mrf.mxu3  ;;  %442 = vst.msk [vmem:[%s1025_s3 + $0x28] sm:$0xff] %vm436_vm8, %v425_v43  ;;  %v289_v55 = vmul.f32 %v728_v40, %v288_v29  ;;  %vm360_vm4 = vweird.f32 %v812_v17  ;;  %v263_v14 = vsel %vm853_vm1, %v679_v7, %v259_v27  ;;  %vm322_vm5 = vmor %vm320_vm12, %vm321_vm2 }
  0x9f   :  { %v837_v46 = vpop.eup %514  ;;  %v428_v48 = vmul.f32 %v712_v28, %v408_v30  ;;  %v402_v49 = vmul.f32 %v386_v19, %v118_v45  ;;  %v130_v50 = vpop.f32.mrf.mxu1  ;;  %v328_v54 = vsub.f32 1.5, %v327_v42  ;;  %v299_v62 = vmul.f32 %v719_v34, %v298_v33  ;;  %vm940_vm12 = vmor %vm340_vm13, %vm341_vm14 }
  0xa0   :  { %v365_v53 = vmul.f32 %v837_v46, %v803_v13  ;;  %v318_v57 = vsub.f32 1.5, %v317_v47  ;;  %v886_v63 = vpop.eup %516  ;;  %v338_v61 = vsub.f32 1.5, %v833_v41  ;;  %v293_v3 = vsel %vm870_vm15, %v728_v40, %v289_v55 }
  0xa1   :  { %445 = vst.msk [vmem:[%s1025_s3 + $0x40] sm:$0xff] %vm436_vm8, %v428_v48  ;;  %v422_v60 = vmul.f32 %v712_v28, %v402_v49  ;;  %vm371_vm9 = vweird.f32 %v837_v46  ;;  %v355_v4 = vmul.f32 %v886_v63, %v812_v17  ;;  %vm361_vm10 = vweird.f32 %v886_v63 }
  0xa2   :  { %v880_v58 = vpop.xlane.xlu0 %222  ;;  %v366_v1 = vmul.f32 %v837_v46, %v365_v53  ;;  %v319_v5 = vmul.f32 %v816_v20, %v318_v57  ;;  %v911_v40 = vpop.eup %518  ;;  %v390_v8 = vmin.f32 %v293_v3, 1e+12  ;;  %v329_v9 = vmul.f32 %v805_v15, %v328_v54  ;;  %vm954_vm0 = vmor %vm370_vm3, %vm371_vm9 }
  0xa3   :  { %520 = vrsqrt.f32 %v880_v58  ;;  %439 = vst.msk [vmem:[%s1025_s3 + $0x10] sm:$0xff] %vm436_vm8, %v422_v60  ;;  %v387_v56 = vmin.f32 %v263_v14, 1e+12  ;;  %v356_v12 = vmul.f32 %v886_v63, %v355_v4  ;;  %v345_v6 = vmul.f32 %v911_v40, %v814_v18  ;;  %vm362_vm13 = vmor %vm360_vm4, %vm361_vm10 }
  0xa4   :  { %v367_v11 = vmul.f32 0.5, %v366_v1  ;;  %v323_v16 = vsel %vm322_vm5, %v816_v20, %v319_v5  ;;  %v303_v44 = vsel %vm898_vm7, %v719_v34, %v299_v62  ;;  %v406_v10 = vmul.f32 %v390_v8, %v130_v50 }
  0xa5   :  { %v142_v19 = vpop.f32.mrf.mxu2  ;;  %v393_v22 = vmin.f32 %v323_v16, 1e+12  ;;  %v333_v23 = vsel %vm332_vm6, %v805_v15, %v329_v9  ;;  %v357_v39 = vmul.f32 0.5, %v356_v12  ;;  %v346_v25 = vmul.f32 %v911_v40, %v345_v6 }
  0xa6   :  { %v368_v21 = vsub.f32 1.5, %v367_v11  ;;  %v121_v24 = vpop.f32.mrf.mxu0  ;;  %v394_v26 = vmin.f32 %v333_v23, 1e+12  ;;  %v426_v33 = vmul.f32 %v712_v28, %v406_v10  ;;  %v391_v34 = vmin.f32 %v303_v44, 1e+12  ;;  %v154_v36 = vpop.f32.mrf.mxu3 }
  0xa7   :  { %v403_v27 = vmul.f32 %v387_v56, %v121_v24  ;;  %v133_v29 = vpop.f32.mrf.mxu1  ;;  %v409_v32 = vmul.f32 %v393_v22, %v831_v37  ;;  %v358_v35 = vsub.f32 1.5, %v357_v39  ;;  %v347_v30 = vmul.f32 0.5, %v346_v25 }
  0xa8   :  { %v369_v20 = vmul.f32 %v837_v46, %v368_v21  ;;  %vm351_vm11 = vweird.f32 %v911_v40  ;;  %443 = vst.msk [vmem:[%s1025_s3 + $0x30] sm:$0xff] %vm436_vm8, %v426_v33  ;;  %v410_v42 = vmul.f32 %v394_v26, %v142_v19  ;;  %v407_v45 = vmul.f32 %v391_v34, %v133_v29 }
  0xa9   :  { %v521_v31 = vpop.eup %520  ;;  %v429_v37 = vmul.f32 %v712_v28, %v409_v32  ;;  %v423_v43 = vmul.f32 %v712_v28, %v403_v27  ;;  %v359_v47 = vmul.f32 %v886_v63, %v358_v35  ;;  %v348_v48 = vsub.f32 1.5, %v347_v30 }
  0xaa   :  { %v375_v15 = vmul.f32 %v521_v31, %v880_v58  ;;  %v339_v50 = vmul.f32 %v787_v2, %v338_v61  ;;  %vm350_vm14 = vweird.f32 %v814_v18  ;;  %v430_v13 = vmul.f32 %v712_v28, %v410_v42 }
  0xab   :  { %446 = vst.msk [vmem:[%s1025_s3 + $0x48] sm:$0xff] %vm436_vm8, %v429_v37  ;;  %v427_v52 = vmul.f32 %v712_v28, %v407_v45  ;;  %v373_v54 = vsel %vm954_vm0, %v837_v46, %v369_v20  ;;  %v349_v53 = vmul.f32 %v911_v40, %v348_v48  ;;  %v363_v17 = vsel %vm362_vm13, %v886_v63, %v359_v47  ;;  %vm352_vm1 = vmor %vm350_vm14, %vm351_vm11 }
  0xac   :  { %v376_v49 = vmul.f32 %v521_v31, %v375_v15  ;;  %440 = vst.msk [vmem:[%s1025_s3 + $0x18] sm:$0xff] %vm436_vm8, %v423_v43  ;;  %v343_v59 = vsel %vm940_vm12, %v787_v2, %v339_v50  ;;  %v397_v46 = vmin.f32 %v363_v17, 1e+12  ;;  %vm381_vm2 = vweird.f32 %v521_v31 }
  0xad   :  { %v145_v18 = vpop.f32.mrf.mxu2  ;;  %447 = vst.msk [vmem:[%s1025_s3 + $0x50] sm:$0xff] %vm436_vm8, %v430_v13  ;;  %v395_v57 = vmin.f32 %v343_v59, 1e+12  ;;  %v353_v60 = vsel %vm352_vm1, %v911_v40, %v349_v53  ;;  %v398_v2 = vmin.f32 %v373_v54, 1e+12  ;;  %vm380_vm3 = vweird.f32 %v880_v58 }
  0xae   :  { %v377_v55 = vmul.f32 0.5, %v376_v49  ;;  %444 = vst.msk [vmem:[%s1025_s3 + $0x38] sm:$0xff] %vm436_vm8, %v427_v52  ;;  %v396_v62 = vmin.f32 %v353_v60, 1e+12  ;;  %v413_v63 = vmul.f32 %v397_v46, %v847_v51  ;;  %vm382_vm15 = vmor %vm380_vm3, %vm381_vm2  ;;  %v157_v11 = vpop.f32.mrf.mxu3 }
  0xaf   :  { %v411_v61 = vmul.f32 %v395_v57, %v145_v18  ;;  %v414_v3 = vmul.f32 %v398_v2, %v154_v36 }
  0xb0   :  { %v378_v14 = vsub.f32 1.5, %v377_v55  ;;  %v412_v7 = vmul.f32 %v396_v62, %v782_v0  ;;  %v433_v4 = vmul.f32 %v712_v28, %v413_v63 }
  0xb1   :  { %v431_v5 = vmul.f32 %v712_v28, %v411_v61  ;;  %v434_v40 = vmul.f32 %v712_v28, %v414_v3 }
  0xb2   :  { %v379_v1 = vmul.f32 %v521_v31, %v378_v14  ;;  %v432_v9 = vmul.f32 %v712_v28, %v412_v7  ;;  %450 = vst.msk [vmem:[%s1025_s3 + $0x68] sm:$0xff] %vm436_vm8, %v433_v4 }
  0xb3   :  { %448 = vst.msk [vmem:[%s1025_s3 + $0x58] sm:$0xff] %vm436_vm8, %v431_v5 }
  0xb4   :  { %v383_v8 = vsel %vm382_vm15, %v521_v31, %v379_v1  ;;  %449 = vst.msk [vmem:[%s1025_s3 + $0x60] sm:$0xff] %vm436_vm8, %v432_v9 }
  0xb5   :  { %v399_v51 = vmin.f32 %v383_v8, 1e+12  ;;  %451 = vst.msk [vmem:[%s1025_s3 + $0x70] sm:$0xff] %vm436_vm8, %v434_v40 }
  0xb7   :  { %v415_v0 = vmul.f32 %v399_v51, %v157_v11 }
  0xb9   :  { %v435_v58 = vmul.f32 %v712_v28, %v415_v0 }
  0xbb   :  { %452 = vst.msk [vmem:[%s1025_s3 + $0x78] sm:$0xff] %vm436_vm8, %v435_v58 }

</bundles_post_ra>
